<compile_context>
chip_gen: v7x
topology: tpu7x:2x2x1
jax: 0.10.0
libtpu: 0.0.40
codegen_flags: <defaults>
</compile_context>

<pallas_src>
import jax
import jax.numpy as jnp
from jax.experimental import pallas as pl
from jax.experimental.pallas import tpu as pltpu

_LANE = 128
# Cap on TB*TL elements per block: 64K lanes of f32 -> ~3 MiB real HBM traffic
# per step (x + out, C_in=4/C_out=8) and ~8 MiB of double-buffered VMEM
# (x padded to 8 sublanes + out, x2 buffers) -- safe on all generations.
_MAX_TILE_ELEMS = 65536
# Don't shrink the length tile below this just to manufacture extra grid steps
# (~400 KiB of real bytes/step is still a useful DMA).
_MIN_SPLIT_TL = 8192


def _round_up(x, m):
    return ((x + m - 1) // m) * m


def _pick_tiles(B, L_pad):
    """Pick (TB, TL, L_full): TB | B, TL | L_full, L_full >= L_pad (lane aligned)."""
    # Length tile: largest power-of-two multiple of 128 under the element cap
    # that wastes <= 12.5% on tail padding.
    tl = _LANE
    cand = _MAX_TILE_ELEMS
    while cand >= _LANE:
        if cand <= L_pad and _round_up(L_pad, cand) * 8 <= L_pad * 9:
            tl = cand
            break
        cand //= 2
    # Prefer >= 8 total grid steps (double-buffer overlap, v7x 2-TC sharding),
    # as long as each step still moves a useful amount of HBM traffic.
    while B * (_round_up(L_pad, tl) // tl) < 8 and tl // 2 >= _MIN_SPLIT_TL:
        tl //= 2
    L_full = _round_up(L_pad, tl)
    n_l_tiles = L_full // tl
    # Batch fusion: when each per-batch length tile is small, fuse batches per
    # block to amortize the ~0.35us/step overhead, but keep >= 8 grid steps.
    tb = 1
    while (B % (tb * 2) == 0
           and tb * 2 * tl <= _MAX_TILE_ELEMS
           and (B // (tb * 2)) * n_l_tiles >= 8):
        tb *= 2
    return tb, tl, L_full


def zero_conv_kernel(w_ref, x_ref, o_ref):
    # w_ref: (C_out, C_in)   -- same block every grid step -> stays in VMEM.
    # x_ref: (TB, C_in, TL)  -- NCL: channels on sublanes, L on the lane axis.
    # o_ref: (TB, C_out, TL)
    # Tiny contraction (C_in=4): purely HBM-bound; MXU padding is noise.
    w = w_ref[...]
    # TB is a small static constant -> unrolled; each iteration is a plain
    # (C_out, C_in) @ (C_in, TL) matmul (no batched-dot transposes).
    for b in range(x_ref.shape[0]):
        o_ref[b] = jnp.dot(
            w, x_ref[b], preferred_element_type=jnp.float32
        ).astype(o_ref.dtype)


def zero_conv_block(x, weight):
    """x: (B, C_in, L) float32 (NCL, matching PyTorch Conv1d input).
    weight: (C_out, C_in) float32 (Conv1d weight squeezed over the size-1 kernel dim).
    Returns (B, C_out, L) float32."""
    B, C_in, L = x.shape
    C_out = weight.shape[0]

    L_pad = _round_up(L, _LANE)
    TB, TL, L_full = _pick_tiles(B, L_pad)
    if L_full != L:
        # Pad L so every block is full-size and lane-aligned (unmasked stores,
        # fully pipelined grid). Padded tail is sliced off below.
        x = jnp.pad(x, ((0, 0), (0, 0), (0, L_full - L)))

    grid = (B // TB, L_full // TL)

    cost = pl.CostEstimate(
        flops=2 * B * L_full * C_in * C_out,
        transcendentals=0,
        bytes_accessed=4 * (B * C_in * L_full + C_in * C_out + B * C_out * L_full),
    )

    # TODO(synk): if the zero weight is a compile-time constant (pure zero-init
    # inference), the whole call could be replaced by jnp.zeros at trace time.
    out = pl.pallas_call(
        zero_conv_kernel,
        out_shape=jax.ShapeDtypeStruct((B, C_out, L_full), x.dtype),
        grid=grid,
        in_specs=[
            # Weight: same (0, 0) block for every grid point -> VMEM-resident.
            pl.BlockSpec((C_out, C_in), lambda b, l: (0, 0)),
            # X tile: TB batches, channels on sublanes, length on lanes.
            pl.BlockSpec((TB, C_in, TL), lambda b, l: (b, 0, l)),
        ],
        out_specs=pl.BlockSpec((TB, C_out, TL), lambda b, l: (b, 0, l)),
        compiler_params=pltpu.CompilerParams(
            dimension_semantics=("parallel", "parallel"),
        ),
        cost_estimate=cost,
    )(weight, x)

    if L_full != L:
        out = out[:, :, :L]
    return out


if __name__ == "__main__":
    key = jax.random.PRNGKey(0)
    kx, kw, k2, k3, k4 = jax.random.split(key, 5)

    B, C_in, C_out, L = 2, 4, 8, 16
    x = jax.random.normal(kx, (B, C_in, L), dtype=jnp.float32)

    # (1) Validate matmul / index maps with a NONZERO weight at the module's
    #     small shape (zero weight would pass trivially). L=16 exercises the
    #     wrapper pad-to-128 + slice path.
    w_rand = jax.random.normal(kw, (C_out, C_in), dtype=jnp.float32)
    out_rand = jax.block_until_ready(zero_conv_block(x, w_rand))
    ref_rand = jnp.einsum("oi,bil->bol", w_rand, x)
    assert out_rand.shape == (B, C_out, L), out_rand.shape
    assert jnp.allclose(out_rand, ref_rand, atol=1e-5, rtol=1e-5), \
        "mismatch vs reference (random weight)"

    # (2) Lane-aligned multi-tile path (L=384 -> TL=128, 3 tiles per batch).
    x2 = jax.random.normal(k2, (B, C_in, 384), dtype=jnp.float32)
    out2 = jax.block_until_ready(zero_conv_block(x2, w_rand))
    assert jnp.allclose(out2, jnp.einsum("oi,bil->bol", w_rand, x2),
                        atol=1e-5, rtol=1e-5), "mismatch (tiled path)"

    # (3) Unaligned L -> wrapper pad (1000 -> 1024) + output slice path.
    x3 = jax.random.normal(k3, (B, C_in, 1000), dtype=jnp.float32)
    out3 = jax.block_until_ready(zero_conv_block(x3, w_rand))
    assert out3.shape == (B, C_out, 1000)
    assert jnp.allclose(out3, jnp.einsum("oi,bil->bol", w_rand, x3),
                        atol=1e-5, rtol=1e-5), "mismatch (unaligned path)"

    # (4) Batch-fused path (B=16, L=128 -> TB=2 batches per block).
    x4 = jax.random.normal(k4, (16, C_in, 128), dtype=jnp.float32)
    out4 = jax.block_until_ready(zero_conv_block(x4, w_rand))
    assert jnp.allclose(out4, jnp.einsum("oi,bil->bol", w_rand, x4),
                        atol=1e-5, rtol=1e-5), "mismatch (batch-fused path)"

    # (5) Module semantics: zero-initialized weight -> all-zero output.
    w_zero = jnp.zeros((C_out, C_in), dtype=jnp.float32)
    out_zero = jax.block_until_ready(zero_conv_block(x, w_zero))
    assert jnp.allclose(out_zero, jnp.zeros((B, C_out, L), jnp.float32)), \
        "zero-weight output not zero"

    print("KERNEL_OK")
</pallas_src>

<mosaic_0001>
module attributes {stable_mosaic.version = 11 : i64} {
  func.func @zero_conv_kernel(%arg0: i32, %arg1: i32, %arg2: memref<8x4xf32, #tpu.memory_space<vmem>>, %arg3: memref<1x4x128xf32, #tpu.memory_space<vmem>>, %arg4: memref<1x8x128xf32, #tpu.memory_space<vmem>>) attributes {dimension_semantics = [#tpu.dimension_semantics<parallel>, #tpu.dimension_semantics<parallel>], iteration_bounds = array<i64: 2, 1>, scalar_prefetch = 0 : i64, scratch_operands = 0 : i64, tpu.core_type = #tpu.core_type<tc>, window_params = [{pipeline_mode = #tpu.pipeline_mode<synchronous>, transform_indices = @transform_0, window_bounds = array<i64: 8, 4>}, {transform_indices = @transform_1, window_bounds = array<i64: 1, 4, 128>}, {transform_indices = @transform_2, window_bounds = array<i64: 1, 8, 128>}]} {
    %c0 = arith.constant 0 : index
    %c0_0 = arith.constant 0 : index
    %0 = vector.load %arg2[%c0, %c0_0] : memref<8x4xf32, #tpu.memory_space<vmem>>, vector<8x4xf32>
    %c0_1 = arith.constant 0 : index
    %c0_2 = arith.constant 0 : index
    %c0_3 = arith.constant 0 : index
    %1 = vector.load %arg3[%c0_1, %c0_2, %c0_3] : memref<1x4x128xf32, #tpu.memory_space<vmem>>, vector<1x4x128xf32>
    %2 = vector.shape_cast %1 : vector<1x4x128xf32> to vector<4x128xf32>
    %cst = arith.constant dense<0.000000e+00> : vector<8x128xf32>
    %3 = tpu.matmul %0, %2, %cst {dimension_numbers = #tpu.dot_dimension_numbers<[1], [0], [0], [1], [0, 0, 1, 1], [], []>} : vector<8x4xf32>, vector<4x128xf32>, vector<8x128xf32> -> vector<8x128xf32>
    %c0_4 = arith.constant 0 : index
    %c0_5 = arith.constant 0 : index
    %c0_6 = arith.constant 0 : index
    %4 = vector.load %arg4[%c0_4, %c0_5, %c0_6] : memref<1x8x128xf32, #tpu.memory_space<vmem>>, vector<1x8x128xf32>
    %5 = vector.shape_cast %4 : vector<1x8x128xf32> to vector<8x128xf32>
    %6 = vector.shape_cast %3 : vector<8x128xf32> to vector<1x8x128xf32>
    tpu.vector_store %arg4[%c0_4, %c0_5, %c0_6], %6 {strides = array<i32>} : memref<1x8x128xf32, #tpu.memory_space<vmem>>, vector<1x8x128xf32>,
    return
  }
  func.func @transform_0(%arg0: i32, %arg1: i32) -> (i32, i32) {
    %c0_i32 = arith.constant 0 : i32
    %c0_i32_0 = arith.constant 0 : i32
    %c0_i32_1 = arith.constant 0 : i32
    return %c0_i32, %c0_i32_0 : i32, i32
  }
  func.func @transform_1(%arg0: i32, %arg1: i32) -> (i32, i32, i32) {
    %c0_i32 = arith.constant 0 : i32
    %c0_i32_0 = arith.constant 0 : i32
    return %arg0, %c0_i32, %arg1 : i32, i32, i32
  }
  func.func @transform_2(%arg0: i32, %arg1: i32) -> (i32, i32, i32) {
    %c0_i32 = arith.constant 0 : i32
    %c0_i32_0 = arith.constant 0 : i32
    return %arg0, %c0_i32, %arg1 : i32, i32, i32
  }
}

</mosaic_0001>

<bundles_post_ra>
// kernel: tpu_custom_call.1
= control target key start
LH: loop header
LB: loop body
LE: loop exit
PB: predicated region body
PF: predicated region fallthrough
CT: control target
= control target key end

     0   :  { %7 = vsyncpa [#allocation3], 0  ;;  %s621_s0 = inlined_call_operand.vmem [shape: f32[8,4], index: 0, kind: input, shape index: {}]   ;;  %s622_s1 = inlined_call_operand.vmem [shape: f32[2,4,128], index: 1, kind: input, shape index: {}]   ;;  %s623_s2 = inlined_call_operand.hbm [shape: f32[2,8,128], index: 2, kind: output, shape index: {}]  }
   0x1   :  { %9 = vsyncpa [#allocation3 + $0x1], 0  ;;  %s506_s9 = smov 0   ;;  %s508_s10 = smov 0  }
   0x2   :  { %s510_s11 = smov 0   ;;  %s512_s12 = smov 0  }
   0x3   :  { %s514_s13 = smov 0   ;;  %s516_s14 = smov 0  }
   0x4 LB: > { %s331_s15 = sadd.s32 4294967295, %s486_s14   ;;  %s332_s16 = sadd.s32 4294967294, %s486_s14   ;;  %s486_s14 = sphi %s516_s14, %s15_s14   ;;  %s482_s13 = sphi %s514_s13, %s630_s13   ;;  %s478_s12 = sphi %s512_s12, %s629_s12   ;;  %s474_s11 = sphi %s510_s11, %s628_s11   ;;  %s470_s10 = sphi %s508_s10, %s627_s10   ;;  %s466_s9 = sphi %s506_s9, %s626_s9  }
   0x5   : > { %s27_s17 = sadd.s32 1, %s482_s13  ;;  %s85_s18 = sadd.s32 1, %s474_s11 }
   0x6   : > { %p29_p0 = scmp.ge.s32.totalorder %s27_s17, 2  ;;  %p95_p1 = scmp.ne.s32.totalorder %s474_s11, %s470_s10 }
   0x7   : > { %p96_p2 = scmp.eq.s32.totalorder %s331_s15, 1  ;;  %p101_p3 = scmp.ne.s32.totalorder %s470_s10, %s466_s9 }
   0x8   : > { %s632_s17 = smov (%p29_p0, %s27_s17), 0  ;;  %p102_p5 = scmp.eq.s32.totalorder %s332_s16, 1 }
   0x9   : > { %p546_p4 = por %p96_p2, %p95_p1  ;;  %s80_s20 = ssub.s32 %s482_s13, %s632_s17 }
   0xa   : > { %p335_p6 = scmp.ge.s32.totalorder %s486_s14, 1  ;;  %p83_p7 = scmp.eq.s32.totalorder %s80_s20, 0 }
   0xb   : > { %p553_p8 = por %p102_p5, %p101_p3  ;;  %p133_p9 = scmp.lt.s32.totalorder %s486_s14, 3 }
   0xc   : > { %s559_s22 = scalar_select %p83_p7, %s474_s11, %s85_s18  }
   0xd   : > { %p134_p10 = pnand %p335_p6, %p133_p9 }
   0xe   : > { %p157_p11 = scmp.lt.s32.totalorder (!%p134_p10), %s478_s12, 1  ;;  %v488_v0 = vmov (!%p134_p10), 0.0   ;;  %vm489_vm0 = vmmov (!%p134_p10), 0   ;;  %vm170_vm1 = vcmask (!%p134_p10), 1043456   ;;  %v164_v1 = vld [vmem:[%s621_s0] sm:$0xff] (!%p134_p10)  ;;  %vm166_vm2 = vcmask (!%p134_p10), 31744  }
   0xf   : > { %137 = sbr.rel (%p134_p10) target bundleno = 254 (0xfe), region = 28  ;;  %346 = vmatprep.subr.mxu0 (!%p134_p10), %v488_v0  ;;  %348 = vmatprep.mubr.msk.f32.mxu0 (!%p134_p10), %vm489_vm0, %v488_v0  ;;  %s154_s30 = sand.u32 (!%p134_p10), 1, %s470_s10  }
  0x10   : > { %s336_s3 = sshll.u32 (!%p134_p10), %s154_s30, 3  ;;  %s341_s6 = sshll.u32 (!%p134_p10), %s478_s12, 7 }
  0x11   : > { %s156_s4 = scalar_lea.vmem (!%p134_p10), [#allocation2], %s336_s3  ;;  %s576_s15 = scalar_lea.hbm (!%p134_p10), %s623_s2, %s341_s6 }
  0x12   : > { %s260_s5 = sshll.u32 (!%p134_p10), %s156_s4, 4  ;;  %s246_s16 = scalar_lea.sflag (!%p134_p10), [#allocation3], %s154_s30  ;;  %s571_s5 = int_to_ptr.vmem [resolvable:$true] %s260_s5 }
  0x13   : > { %s408_s18 = scalar_lea.vmem (!%p134_p10), %s571_s5, 128 }
  0x14   : > { %p409_p12 = scmp.ne.s32.totalorder (!%p134_p10), %s571_s5, %s408_s18 }
  0x16   : > { %s158_s23 = scalar_select %p157_p11, %s478_s12, 1 }
  0x17   : > { %p410_p13 = pnand %p409_p12, %p546_p4  ;;  %s490_s12 = smov [#allocation2]  }
  0x18   : > { %s337_s24 = sshll.u32 %s158_s23, 2  ;;  %s412_s20 = sshll.u32 %s490_s12, 4  ;;  %s413_s20 = int_to_ptr.vmem [resolvable:$false] %s412_s20 }
  0x19   : > { %s163_s27 = scalar_lea.vmem %s622_s1, %s337_s24  ;;  %p411_p0 = pneg %p410_p13 }
  0x1a   : > { %v165_v2 = vld [vmem:[%s163_s27] sm:$0xf]  ;;  %s414_s23 = scalar_lea.vmem %s413_s20, 256  ;;  %p415_p1 = scmp.lt.s32.totalorder %s571_s5, %s413_s20 }
  0x1b   : > { %347 = vmatpush3.msk.msra.mxu0 %vm170_vm1, %v165_v2  ;;  %p416_p2 = scmp.lt.s32.totalorder %s414_s23, %s408_s18 }
  0x1c   : > { %349 = vmatmul.mubr.msk.f32.vlgmr.msra.gmra.mrb[0].mxu0 %vm166_vm2, %v164_v1 }
  0x1d   : > { %p417_p3 = por %p416_p2, %p415_p1 }
  0x1f   : > { %p418_p5 = pnand %p417_p3, %p411_p0 }
  0xef   : > { %v240_v3 = vpop.f32.mrb[0].mxu0 }
  0xf0   : > { %244 = vst [vmem:[%s156_s4] sm:$0xff] %v240_v3  ;;  %v350_v4 = vpop.f32.mrb[1].mxu0 }
  0xf1   : > { %421 = shalt.err (!%p418_p5)
}
  0xf2   : > { %s422_s24 = scalar_lea.hbm %s576_s15, 128  ;;  %s426_s27 = scalar_lea.hbm %s623_s2, 256 }
  0xf3   : > { %p423_p6 = scmp.ne.s32.totalorder %s576_s15, %s422_s24  ;;  %p427_p10 = scmp.lt.u32.totalorder %s576_s15, %s623_s2 }
  0xf4   : > { %p428_p11 = scmp.lt.u32.totalorder %s426_s27, %s422_s24  ;;  %p430_p13 = scmp.lt.u32.totalorder %s422_s24, %s576_s15 }
  0xf5   : > { %p424_p7 = pnand %p423_p6, %p546_p4 }
  0xf6   : > { %p429_p12 = por %p428_p11, %p427_p10 }
  0xf7   : > { %p425_p9 = pneg %p424_p7 }
  0xf8   : > { %p431_p0 = por %p430_p13, %p429_p12 }
  0xfa   : > { %p432_p1 = pnand %p431_p0, %p425_p9 }
  0xfc   : > { %435 = shalt.err (!%p432_p1)
}
  0xfd   : > { %351 = dma.vmem_to_hbm [thread:$0]  (%p546_p4), %s571_s5, 128, %s576_s15, %s246_s16  }
  0xfe PF: > { %p357_p2 = scmp.ge.s32.totalorder %s486_s14, 2  ;;  %s272_s30 = sand.u32 1, %s466_s9  }
  0xff   : > { %s273_s3 = scalar_lea.sflag [#allocation3], %s272_s30 }
 0x100   : > { %p354_p3 = pnand %p357_p2, %p553_p8 }
 0x102   : > { %461 = dma.done.wait (!%p354_p3), %s273_s3, 128  }
 0x103   : > { %463 = vsyncadd (!%p354_p3), %s273_s3, 4294967168  ;;  %s15_s14 = sadd.s32 1, %s486_s14   ;;  %s626_s9 = smov %s470_s10 }
 0x104   : > { %p12_p5 = scmp.ge.s32.totalorder %s15_s14, 4   ;;  %s627_s10 = smov %s474_s11 }
 0x105   : > { %s628_s11 = smov %s559_s22  ;;  %s629_s12 = smov %s482_s13 }
 0x106   : > { %s630_s13 = smov %s632_s17  ;;  %14 = sbr.rel (!%p12_p5) target bundleno = 4 (0x4), region = 63 }
 0x10d   :  { %278 = vsyncpa [#allocation3], 1 }
 0x10e   :  { %280 = vsyncpa [#allocation3 + $0x1], 1 }

</bundles_post_ra>
